<compile_context>
chip_gen: v7x
topology: tpu7x:2x2x1
jax: 0.10.0
libtpu: 0.0.40
codegen_flags: <defaults>
</compile_context>

<pallas_src>
import functools

import jax
import jax.numpy as jnp
from jax.experimental import pallas as pl
from jax.experimental.pallas import tpu as pltpu

N_NODES = 21   # fixed by fc1 in_features = 441 = 21 * 21
GC_DIM = 21    # GCNConv output channels
OUT_ROWS, OUT_LANES = 8, 128   # lane-dense packed output block

# bias-pack row assignment (row i of the packed (8, BW) bias block)
_B_GC1, _B_GC2, _B_FC1, _B_FC2, _B_FC3, _B_FC4, _B_PI, _B_V = range(8)


# ---------------------------------------------------------------------------
# Fused kernel: GCN x2 -> flatten -> fc1..fc4 -> pi / v heads
# ---------------------------------------------------------------------------
def _fused_kernel(adj_ref, x_ref,
                  g1w_ref, g2w_ref,
                  f1w_ref, f2w_ref, f3w_ref, f4w_ref,
                  piw_ref, vw_ref, b_ref,
                  out_ref, h2_s):
    f32 = jnp.float32
    fc1 = f1w_ref.shape[2]
    fc2 = f2w_ref.shape[1]
    fc3 = f3w_ref.shape[1]
    fc4 = f4w_ref.shape[1]
    n_act = piw_ref.shape[1]

    # Unpack biases from the single packed block (static slices; zero-cost views).
    g1b = b_ref[_B_GC1:_B_GC1 + 1, 0:GC_DIM]
    g2b = b_ref[_B_GC2:_B_GC2 + 1, 0:GC_DIM]
    f1b = b_ref[_B_FC1:_B_FC1 + 1, 0:fc1]
    f2b = b_ref[_B_FC2:_B_FC2 + 1, 0:fc2]
    f3b = b_ref[_B_FC3:_B_FC3 + 1, 0:fc3]
    f4b = b_ref[_B_FC4:_B_FC4 + 1, 0:fc4]
    pib = b_ref[_B_PI:_B_PI + 1, 0:n_act]
    vb = b_ref[_B_V:_B_V + 1, 0:1]

    a = adj_ref[...]

    # GCN layer 1: (A @ X) @ W1 + b1   (reassociated; same result, fewer FLOPs)
    ax = jnp.dot(a, x_ref[...], preferred_element_type=f32)
    h1 = jnp.dot(ax, g1w_ref[...], preferred_element_type=f32) + g1b
    # GCN layer 2: (A @ h1) @ W2 + b2
    ah1 = jnp.dot(a, h1, preferred_element_type=f32)
    h2 = jnp.dot(ah1, g2w_ref[...], preferred_element_type=f32) + g2b
    h2_s[...] = h2   # stays in VMEM; never goes back to HBM

    # fc1 on the row-major flatten of h2:
    #   flat @ W1 == sum_n h2[n, :] @ W1[n*21:(n+1)*21, :]   (W1 pre-reshaped to (21, 21, fc1))
    acc = f1b.astype(f32)                                 # (1, fc1), start from bias
    for n in range(N_NODES):                              # 21 tiny unrolled MXU dots
        row = h2_s[pl.ds(n, 1), :]                        # (1, GC_DIM)
        acc = acc + jnp.dot(row, f1w_ref[n].astype(f32),
                            preferred_element_type=f32)
    x1 = jnp.maximum(acc, 0.0)
    x2 = jnp.maximum(jnp.dot(x1, f2w_ref[...].astype(f32),
                             preferred_element_type=f32) + f2b, 0.0)
    vx = jnp.maximum(jnp.dot(x2, f3w_ref[...].astype(f32),
                             preferred_element_type=f32) + f3b, 0.0)
    vx = jnp.maximum(jnp.dot(vx, f4w_ref[...].astype(f32),
                             preferred_element_type=f32) + f4b, 0.0)
    pi = jnp.dot(x2, piw_ref[...], preferred_element_type=f32) + pib   # (1, n_actions)
    v = jnp.dot(vx, vw_ref[...], preferred_element_type=f32) + vb      # (1, 1)

    # Pack both heads into one lane-dense (8, 128) block -> single output DMA.
    out_ref[...] = jnp.zeros_like(out_ref)
    out_ref[0:1, 0:n_act] = pi
    out_ref[1:2, 0:1] = v


# ---------------------------------------------------------------------------
# Wrapper
# ---------------------------------------------------------------------------
_VMEM_SPEC = pl.BlockSpec(memory_space=pltpu.MemorySpace.VMEM)


@functools.partial(jax.jit, static_argnames=('n_actions',))
def graph_actor_critic_forward(state, adj_norm, kparams, n_actions):
    """state: [B, N, F_node] f32, adj_norm: [N, N] f32, kparams: prepare_params() output."""
    x0 = state[0]   # only batch 0 reaches the heads (matches torch `[0]` after flatten)

    args = (adj_norm, x0,
            kparams['gc1_w'], kparams['gc2_w'],
            kparams['fc1_w'], kparams['fc2_w'],
            kparams['fc3_w'], kparams['fc4_w'],
            kparams['pi_w'], kparams['v_w'],
            kparams['biases'])

    out = pl.pallas_call(
        _fused_kernel,
        out_shape=jax.ShapeDtypeStruct((OUT_ROWS, OUT_LANES), jnp.float32),
        in_specs=[_VMEM_SPEC] * len(args),     # whole arrays, one DMA each, no grid
        out_specs=_VMEM_SPEC,
        scratch_shapes=[pltpu.VMEM((N_NODES, GC_DIM), jnp.float32)],
    )(*args)

    pi = out[0, :n_actions]   # [n_actions]
    v = out[1, :1]            # [1]
    return pi, v


# ---------------------------------------------------------------------------
# Parameter construction & preparation (synthetic, deterministic)
# ---------------------------------------------------------------------------
def make_params(key, hp):
    """Torch-Linear-style init; weights stored as [in_features, out_features]."""
    def lin(k, fan_in, fan_out):
        kw, kb = jax.random.split(k)
        scale = 1.0 / jnp.sqrt(fan_in)
        w = jax.random.uniform(kw, (fan_in, fan_out), jnp.float32, -scale, scale)
        b = jax.random.uniform(kb, (1, fan_out), jnp.float32, -scale, scale)
        return w, b

    keys = jax.random.split(key, 8)
    p = {}
    p['gc1_w'], p['gc1_b'] = lin(keys[0], hp['node_feature'], GC_DIM)
    p['gc2_w'], p['gc2_b'] = lin(keys[1], GC_DIM, GC_DIM)
    p['fc1_w'], p['fc1_b'] = lin(keys[2], N_NODES * GC_DIM, hp['fc1'])
    p['fc2_w'], p['fc2_b'] = lin(keys[3], hp['fc1'], hp['fc2'])
    p['fc3_w'], p['fc3_b'] = lin(keys[4], hp['fc2'], 256)
    p['fc4_w'], p['fc4_b'] = lin(keys[5], 256, 64)
    p['pi_w'], p['pi_b'] = lin(keys[6], hp['fc2'], hp['n_action'])
    p['v_w'], p['v_b'] = lin(keys[7], 64, 1)
    return p


def prepare_params(p):
    """One-time kernel layout prep.

    * fc1_w reshaped to (21, 21, fc1) for the in-kernel flatten-contraction.
    * fc1..fc4 weights stored bf16 (f32 accumulate in kernel).
    * All 8 biases packed into one lane-dense (8, BW) f32 block -> single DMA.
    """
    fc1_out = p['fc1_w'].shape[1]
    kp = {
        'gc1_w': p['gc1_w'],
        'gc2_w': p['gc2_w'],
        'fc1_w': p['fc1_w'].reshape(N_NODES, GC_DIM, fc1_out).astype(jnp.bfloat16),
        'fc2_w': p['fc2_w'].astype(jnp.bfloat16),
        'fc3_w': p['fc3_w'].astype(jnp.bfloat16),
        'fc4_w': p['fc4_w'].astype(jnp.bfloat16),
        'pi_w': p['pi_w'],
        'v_w': p['v_w'],
    }
    biases = [p['gc1_b'], p['gc2_b'], p['fc1_b'], p['fc2_b'],
              p['fc3_b'], p['fc4_b'], p['pi_b'], p['v_b']]
    bw = max(128, max(int(b.shape[1]) for b in biases))
    bw = ((bw + 127) // 128) * 128          # lane-dense width
    packed = jnp.zeros((8, bw), jnp.float32)
    for i, b in enumerate(biases):
        packed = packed.at[i, :b.shape[1]].set(b[0])
    kp['biases'] = packed
    return kp


def normalize_adj(adj):
    """GCN normalization: D^-1/2 (A + I) D^-1/2 with self loops."""
    a_hat = adj + jnp.eye(adj.shape[0], dtype=adj.dtype)
    deg = a_hat.sum(axis=1)
    d_inv_sqrt = jax.lax.rsqrt(deg)
    return d_inv_sqrt[:, None] * a_hat * d_inv_sqrt[None, :]


# pure-JAX f32 reference for a sanity check
def _reference(state, adj_norm, p):
    x = state[0]
    h1 = adj_norm @ (x @ p['gc1_w']) + p['gc1_b']
    h2 = adj_norm @ (h1 @ p['gc2_w']) + p['gc2_b']
    flat = h2.reshape(1, -1)
    x1 = jax.nn.relu(flat @ p['fc1_w'] + p['fc1_b'])
    x2 = jax.nn.relu(x1 @ p['fc2_w'] + p['fc2_b'])
    vx = jax.nn.relu(x2 @ p['fc3_w'] + p['fc3_b'])
    vx = jax.nn.relu(vx @ p['fc4_w'] + p['fc4_b'])
    pi = x2 @ p['pi_w'] + p['pi_b']
    v = vx @ p['v_w'] + p['v_b']
    return pi[0], v[0]


if __name__ == "__main__":
    HP = {'lr': 1e-3, 'input_dim': 441, 'node_feature': 8,
          'fc1': 128, 'fc2': 64, 'n_action': 6}

    key = jax.random.PRNGKey(0)
    k_state, k_adj, k_params = jax.random.split(key, 3)

    batch = 2
    state = jax.random.normal(k_state, (batch, N_NODES, HP['node_feature']), jnp.float32)

    # random symmetric binary adjacency over 21 nodes (no explicit self loops)
    a_rand = jax.random.uniform(k_adj, (N_NODES, N_NODES))
    adj = (a_rand + a_rand.T > 1.0).astype(jnp.float32)
    adj = adj * (1.0 - jnp.eye(N_NODES))
    adj_norm = normalize_adj(adj)

    params = make_params(k_params, HP)
    kparams = prepare_params(params)

    pi, v = graph_actor_critic_forward(state, adj_norm, kparams, n_actions=HP['n_action'])
    jax.block_until_ready((pi, v))

    pi_ref, v_ref = _reference(state, adj_norm, params)
    assert pi.shape == (HP['n_action'],) and v.shape == (1,)
    assert jnp.allclose(pi, pi_ref, rtol=2e-2, atol=2e-2)
    assert jnp.allclose(v, v_ref, rtol=2e-2, atol=2e-2)

    print("KERNEL_OK")
</pallas_src>

<mosaic_0001>
module attributes {stable_mosaic.version = 11 : i64} {
  func.func @_fused_kernel(%arg0: memref<21x21xf32, #tpu.memory_space<vmem>>, %arg1: memref<21x8xf32, #tpu.memory_space<vmem>>, %arg2: memref<8x21xf32, #tpu.memory_space<vmem>>, %arg3: memref<21x21xf32, #tpu.memory_space<vmem>>, %arg4: memref<21x21x128xbf16, #tpu.memory_space<vmem>>, %arg5: memref<128x64xbf16, #tpu.memory_space<vmem>>, %arg6: memref<64x256xbf16, #tpu.memory_space<vmem>>, %arg7: memref<256x64xbf16, #tpu.memory_space<vmem>>, %arg8: memref<64x6xf32, #tpu.memory_space<vmem>>, %arg9: memref<64x1xf32, #tpu.memory_space<vmem>>, %arg10: memref<8x256xf32, #tpu.memory_space<vmem>>, %arg11: memref<8x128xf32, #tpu.memory_space<vmem>>, %arg12: memref<21x21xf32, #tpu.memory_space<vmem>>) attributes {dimension_semantics = [], scalar_prefetch = 0 : i64, scratch_operands = 1 : i64, tpu.core_type = #tpu.core_type<tc>} {
    %c0 = arith.constant 0 : index
    %c0_0 = arith.constant 0 : index
    %0 = vector.load %arg10[%c0, %c0_0] : memref<8x256xf32, #tpu.memory_space<vmem>>, vector<1x21xf32>
    %c1 = arith.constant 1 : index
    %c0_1 = arith.constant 0 : index
    %1 = vector.load %arg10[%c1, %c0_1] : memref<8x256xf32, #tpu.memory_space<vmem>>, vector<1x21xf32>
    %c2 = arith.constant 2 : index
    %c0_2 = arith.constant 0 : index
    %2 = vector.load %arg10[%c2, %c0_2] : memref<8x256xf32, #tpu.memory_space<vmem>>, vector<1x128xf32>
    %c3 = arith.constant 3 : index
    %c0_3 = arith.constant 0 : index
    %3 = vector.load %arg10[%c3, %c0_3] : memref<8x256xf32, #tpu.memory_space<vmem>>, vector<1x64xf32>
    %c4 = arith.constant 4 : index
    %c0_4 = arith.constant 0 : index
    %4 = vector.load %arg10[%c4, %c0_4] : memref<8x256xf32, #tpu.memory_space<vmem>>, vector<1x256xf32>
    %c5 = arith.constant 5 : index
    %c0_5 = arith.constant 0 : index
    %5 = vector.load %arg10[%c5, %c0_5] : memref<8x256xf32, #tpu.memory_space<vmem>>, vector<1x64xf32>
    %c6 = arith.constant 6 : index
    %c0_6 = arith.constant 0 : index
    %6 = vector.load %arg10[%c6, %c0_6] : memref<8x256xf32, #tpu.memory_space<vmem>>, vector<1x6xf32>
    %c7 = arith.constant 7 : index
    %c0_7 = arith.constant 0 : index
    %7 = vector.load %arg10[%c7, %c0_7] : memref<8x256xf32, #tpu.memory_space<vmem>>, vector<1x1xf32>
    %c0_8 = arith.constant 0 : index
    %c0_9 = arith.constant 0 : index
    %8 = vector.load %arg0[%c0_8, %c0_9] : memref<21x21xf32, #tpu.memory_space<vmem>>, vector<21x21xf32>
    %c0_10 = arith.constant 0 : index
    %c0_11 = arith.constant 0 : index
    %9 = vector.load %arg1[%c0_10, %c0_11] : memref<21x8xf32, #tpu.memory_space<vmem>>, vector<21x8xf32>
    %cst = arith.constant dense<0.000000e+00> : vector<21x8xf32>
    %10 = tpu.matmul %8, %9, %cst {dimension_numbers = #tpu.dot_dimension_numbers<[1], [0], [0], [1], [0, 0, 1, 1], [], []>} : vector<21x21xf32>, vector<21x8xf32>, vector<21x8xf32> -> vector<21x8xf32>
    %c0_12 = arith.constant 0 : index
    %c0_13 = arith.constant 0 : index
    %11 = vector.load %arg2[%c0_12, %c0_13] : memref<8x21xf32, #tpu.memory_space<vmem>>, vector<8x21xf32>
    %cst_14 = arith.constant dense<0.000000e+00> : vector<21x21xf32>
    %12 = tpu.matmul %10, %11, %cst_14 {dimension_numbers = #tpu.dot_dimension_numbers<[1], [0], [0], [1], [0, 0, 1, 1], [], []>} : vector<21x8xf32>, vector<8x21xf32>, vector<21x21xf32> -> vector<21x21xf32>
    %13 = vector.broadcast %0 : vector<1x21xf32> to vector<21x21xf32>
    %14 = arith.addf %12, %13 : vector<21x21xf32>
    %cst_15 = arith.constant dense<0.000000e+00> : vector<21x21xf32>
    %15 = tpu.matmul %8, %14, %cst_15 {dimension_numbers = #tpu.dot_dimension_numbers<[1], [0], [0], [1], [0, 0, 1, 1], [], []>} : vector<21x21xf32>, vector<21x21xf32>, vector<21x21xf32> -> vector<21x21xf32>
    %c0_16 = arith.constant 0 : index
    %c0_17 = arith.constant 0 : index
    %16 = vector.load %arg3[%c0_16, %c0_17] : memref<21x21xf32, #tpu.memory_space<vmem>>, vector<21x21xf32>
    %cst_18 = arith.constant dense<0.000000e+00> : vector<21x21xf32>
    %17 = tpu.matmul %15, %16, %cst_18 {dimension_numbers = #tpu.dot_dimension_numbers<[1], [0], [0], [1], [0, 0, 1, 1], [], []>} : vector<21x21xf32>, vector<21x21xf32>, vector<21x21xf32> -> vector<21x21xf32>
    %18 = vector.broadcast %1 : vector<1x21xf32> to vector<21x21xf32>
    %19 = arith.addf %17, %18 : vector<21x21xf32>
    %c0_19 = arith.constant 0 : index
    %c0_20 = arith.constant 0 : index
    %20 = vector.load %arg12[%c0_19, %c0_20] : memref<21x21xf32, #tpu.memory_space<vmem>>, vector<21x21xf32>
    tpu.vector_store %arg12[%c0_19, %c0_20], %19 {strides = array<i32>} : memref<21x21xf32, #tpu.memory_space<vmem>>, vector<21x21xf32>,
    %c0_21 = arith.constant 0 : index
    %c0_22 = arith.constant 0 : index
    %21 = vector.load %arg12[%c0_21, %c0_22] : memref<21x21xf32, #tpu.memory_space<vmem>>, vector<1x21xf32>
    %c0_23 = arith.constant 0 : index
    %c0_24 = arith.constant 0 : index
    %c0_25 = arith.constant 0 : index
    %22 = vector.load %arg4[%c0_23, %c0_24, %c0_25] : memref<21x21x128xbf16, #tpu.memory_space<vmem>>, vector<1x21x128xbf16>
    %23 = vector.shape_cast %22 : vector<1x21x128xbf16> to vector<21x128xbf16>
    %24 = arith.extf %23 : vector<21x128xbf16> to vector<21x128xf32>
    %cst_26 = arith.constant dense<0.000000e+00> : vector<1x128xf32>
    %25 = tpu.matmul %21, %24, %cst_26 {dimension_numbers = #tpu.dot_dimension_numbers<[1], [0], [0], [1], [0, 0, 1, 1], [], []>} : vector<1x21xf32>, vector<21x128xf32>, vector<1x128xf32> -> vector<1x128xf32>
    %26 = arith.addf %2, %25 : vector<1x128xf32>
    %c1_27 = arith.constant 1 : index
    %c0_28 = arith.constant 0 : index
    %27 = vector.load %arg12[%c1_27, %c0_28] : memref<21x21xf32, #tpu.memory_space<vmem>>, vector<1x21xf32>
    %c1_29 = arith.constant 1 : index
    %c0_30 = arith.constant 0 : index
    %c0_31 = arith.constant 0 : index
    %28 = vector.load %arg4[%c1_29, %c0_30, %c0_31] : memref<21x21x128xbf16, #tpu.memory_space<vmem>>, vector<1x21x128xbf16>
    %29 = vector.shape_cast %28 : vector<1x21x128xbf16> to vector<21x128xbf16>
    %30 = arith.extf %29 : vector<21x128xbf16> to vector<21x128xf32>
    %cst_32 = arith.constant dense<0.000000e+00> : vector<1x128xf32>
    %31 = tpu.matmul %27, %30, %cst_32 {dimension_numbers = #tpu.dot_dimension_numbers<[1], [0], [0], [1], [0, 0, 1, 1], [], []>} : vector<1x21xf32>, vector<21x128xf32>, vector<1x128xf32> -> vector<1x128xf32>
    %32 = arith.addf %26, %31 : vector<1x128xf32>
    %c2_33 = arith.constant 2 : index
    %c0_34 = arith.constant 0 : index
    %33 = vector.load %arg12[%c2_33, %c0_34] : memref<21x21xf32, #tpu.memory_space<vmem>>, vector<1x21xf32>
    %c2_35 = arith.constant 2 : index
    %c0_36 = arith.constant 0 : index
    %c0_37 = arith.constant 0 : index
    %34 = vector.load %arg4[%c2_35, %c0_36, %c0_37] : memref<21x21x128xbf16, #tpu.memory_space<vmem>>, vector<1x21x128xbf16>
    %35 = vector.shape_cast %34 : vector<1x21x128xbf16> to vector<21x128xbf16>
    %36 = arith.extf %35 : vector<21x128xbf16> to vector<21x128xf32>
    %cst_38 = arith.constant dense<0.000000e+00> : vector<1x128xf32>
    %37 = tpu.matmul %33, %36, %cst_38 {dimension_numbers = #tpu.dot_dimension_numbers<[1], [0], [0], [1], [0, 0, 1, 1], [], []>} : vector<1x21xf32>, vector<21x128xf32>, vector<1x128xf32> -> vector<1x128xf32>
    %38 = arith.addf %32, %37 : vector<1x128xf32>
    %c3_39 = arith.constant 3 : index
    %c0_40 = arith.constant 0 : index
    %39 = vector.load %arg12[%c3_39, %c0_40] : memref<21x21xf32, #tpu.memory_space<vmem>>, vector<1x21xf32>
    %c3_41 = arith.constant 3 : index
    %c0_42 = arith.constant 0 : index
    %c0_43 = arith.constant 0 : index
    %40 = vector.load %arg4[%c3_41, %c0_42, %c0_43] : memref<21x21x128xbf16, #tpu.memory_space<vmem>>, vector<1x21x128xbf16>
    %41 = vector.shape_cast %40 : vector<1x21x128xbf16> to vector<21x128xbf16>
    %42 = arith.extf %41 : vector<21x128xbf16> to vector<21x128xf32>
    %cst_44 = arith.constant dense<0.000000e+00> : vector<1x128xf32>
    %43 = tpu.matmul %39, %42, %cst_44 {dimension_numbers = #tpu.dot_dimension_numbers<[1], [0], [0], [1], [0, 0, 1, 1], [], []>} : vector<1x21xf32>, vector<21x128xf32>, vector<1x128xf32> -> vector<1x128xf32>
    %44 = arith.addf %38, %43 : vector<1x128xf32>
    %c4_45 = arith.constant 4 : index
    %c0_46 = arith.constant 0 : index
    %45 = vector.load %arg12[%c4_45, %c0_46] : memref<21x21xf32, #tpu.memory_space<vmem>>, vector<1x21xf32>
    %c4_47 = arith.constant 4 : index
    %c0_48 = arith.constant 0 : index
    %c0_49 = arith.constant 0 : index
    %46 = vector.load %arg4[%c4_47, %c0_48, %c0_49] : memref<21x21x128xbf16, #tpu.memory_space<vmem>>, vector<1x21x128xbf16>
    %47 = vector.shape_cast %46 : vector<1x21x128xbf16> to vector<21x128xbf16>
    %48 = arith.extf %47 : vector<21x128xbf16> to vector<21x128xf32>
    %cst_50 = arith.constant dense<0.000000e+00> : vector<1x128xf32>
    %49 = tpu.matmul %45, %48, %cst_50 {dimension_numbers = #tpu.dot_dimension_numbers<[1], [0], [0], [1], [0, 0, 1, 1], [], []>} : vector<1x21xf32>, vector<21x128xf32>, vector<1x128xf32> -> vector<1x128xf32>
    %50 = arith.addf %44, %49 : vector<1x128xf32>
    %c5_51 = arith.constant 5 : index
    %c0_52 = arith.constant 0 : index
    %51 = vector.load %arg12[%c5_51, %c0_52] : memref<21x21xf32, #tpu.memory_space<vmem>>, vector<1x21xf32>
    %c5_53 = arith.constant 5 : index
    %c0_54 = arith.constant 0 : index
    %c0_55 = arith.constant 0 : index
    %52 = vector.load %arg4[%c5_53, %c0_54, %c0_55] : memref<21x21x128xbf16, #tpu.memory_space<vmem>>, vector<1x21x128xbf16>
    %53 = vector.shape_cast %52 : vector<1x21x128xbf16> to vector<21x128xbf16>
    %54 = arith.extf %53 : vector<21x128xbf16> to vector<21x128xf32>
    %cst_56 = arith.constant dense<0.000000e+00> : vector<1x128xf32>
    %55 = tpu.matmul %51, %54, %cst_56 {dimension_numbers = #tpu.dot_dimension_numbers<[1], [0], [0], [1], [0, 0, 1, 1], [], []>} : vector<1x21xf32>, vector<21x128xf32>, vector<1x128xf32> -> vector<1x128xf32>
    %56 = arith.addf %50, %55 : vector<1x128xf32>
    %c6_57 = arith.constant 6 : index
    %c0_58 = arith.constant 0 : index
    %57 = vector.load %arg12[%c6_57, %c0_58] : memref<21x21xf32, #tpu.memory_space<vmem>>, vector<1x21xf32>
    %c6_59 = arith.constant 6 : index
    %c0_60 = arith.constant 0 : index
    %c0_61 = arith.constant 0 : index
    %58 = vector.load %arg4[%c6_59, %c0_60, %c0_61] : memref<21x21x128xbf16, #tpu.memory_space<vmem>>, vector<1x21x128xbf16>
    %59 = vector.shape_cast %58 : vector<1x21x128xbf16> to vector<21x128xbf16>
    %60 = arith.extf %59 : vector<21x128xbf16> to vector<21x128xf32>
    %cst_62 = arith.constant dense<0.000000e+00> : vector<1x128xf32>
    %61 = tpu.matmul %57, %60, %cst_62 {dimension_numbers = #tpu.dot_dimension_numbers<[1], [0], [0], [1], [0, 0, 1, 1], [], []>} : vector<1x21xf32>, vector<21x128xf32>, vector<1x128xf32> -> vector<1x128xf32>
    %62 = arith.addf %56, %61 : vector<1x128xf32>
    %c7_63 = arith.constant 7 : index
    %c0_64 = arith.constant 0 : index
    %63 = vector.load %arg12[%c7_63, %c0_64] : memref<21x21xf32, #tpu.memory_space<vmem>>, vector<1x21xf32>
    %c7_65 = arith.constant 7 : index
    %c0_66 = arith.constant 0 : index
    %c0_67 = arith.constant 0 : index
    %64 = vector.load %arg4[%c7_65, %c0_66, %c0_67] : memref<21x21x128xbf16, #tpu.memory_space<vmem>>, vector<1x21x128xbf16>
    %65 = vector.shape_cast %64 : vector<1x21x128xbf16> to vector<21x128xbf16>
    %66 = arith.extf %65 : vector<21x128xbf16> to vector<21x128xf32>
    %cst_68 = arith.constant dense<0.000000e+00> : vector<1x128xf32>
    %67 = tpu.matmul %63, %66, %cst_68 {dimension_numbers = #tpu.dot_dimension_numbers<[1], [0], [0], [1], [0, 0, 1, 1], [], []>} : vector<1x21xf32>, vector<21x128xf32>, vector<1x128xf32> -> vector<1x128xf32>
    %68 = arith.addf %62, %67 : vector<1x128xf32>
    %c8 = arith.constant 8 : index
    %c0_69 = arith.constant 0 : index
    %69 = vector.load %arg12[%c8, %c0_69] : memref<21x21xf32, #tpu.memory_space<vmem>>, vector<1x21xf32>
    %c8_70 = arith.constant 8 : index
    %c0_71 = arith.constant 0 : index
    %c0_72 = arith.constant 0 : index
    %70 = vector.load %arg4[%c8_70, %c0_71, %c0_72] : memref<21x21x128xbf16, #tpu.memory_space<vmem>>, vector<1x21x128xbf16>
    %71 = vector.shape_cast %70 : vector<1x21x128xbf16> to vector<21x128xbf16>
    %72 = arith.extf %71 : vector<21x128xbf16> to vector<21x128xf32>
    %cst_73 = arith.constant dense<0.000000e+00> : vector<1x128xf32>
    %73 = tpu.matmul %69, %72, %cst_73 {dimension_numbers = #tpu.dot_dimension_numbers<[1], [0], [0], [1], [0, 0, 1, 1], [], []>} : vector<1x21xf32>, vector<21x128xf32>, vector<1x128xf32> -> vector<1x128xf32>
    %74 = arith.addf %68, %73 : vector<1x128xf32>
    %c9 = arith.constant 9 : index
    %c0_74 = arith.constant 0 : index
    %75 = vector.load %arg12[%c9, %c0_74] : memref<21x21xf32, #tpu.memory_space<vmem>>, vector<1x21xf32>
    %c9_75 = arith.constant 9 : index
    %c0_76 = arith.constant 0 : index
    %c0_77 = arith.constant 0 : index
    %76 = vector.load %arg4[%c9_75, %c0_76, %c0_77] : memref<21x21x128xbf16, #tpu.memory_space<vmem>>, vector<1x21x128xbf16>
    %77 = vector.shape_cast %76 : vector<1x21x128xbf16> to vector<21x128xbf16>
    %78 = arith.extf %77 : vector<21x128xbf16> to vector<21x128xf32>
    %cst_78 = arith.constant dense<0.000000e+00> : vector<1x128xf32>
    %79 = tpu.matmul %75, %78, %cst_78 {dimension_numbers = #tpu.dot_dimension_numbers<[1], [0], [0], [1], [0, 0, 1, 1], [], []>} : vector<1x21xf32>, vector<21x128xf32>, vector<1x128xf32> -> vector<1x128xf32>
    %80 = arith.addf %74, %79 : vector<1x128xf32>
    %c10 = arith.constant 10 : index
    %c0_79 = arith.constant 0 : index
    %81 = vector.load %arg12[%c10, %c0_79] : memref<21x21xf32, #tpu.memory_space<vmem>>, vector<1x21xf32>
    %c10_80 = arith.constant 10 : index
    %c0_81 = arith.constant 0 : index
    %c0_82 = arith.constant 0 : index
    %82 = vector.load %arg4[%c10_80, %c0_81, %c0_82] : memref<21x21x128xbf16, #tpu.memory_space<vmem>>, vector<1x21x128xbf16>
    %83 = vector.shape_cast %82 : vector<1x21x128xbf16> to vector<21x128xbf16>
    %84 = arith.extf %83 : vector<21x128xbf16> to vector<21x128xf32>
    %cst_83 = arith.constant dense<0.000000e+00> : vector<1x128xf32>
    %85 = tpu.matmul %81, %84, %cst_83 {dimension_numbers = #tpu.dot_dimension_numbers<[1], [0], [0], [1], [0, 0, 1, 1], [], []>} : vector<1x21xf32>, vector<21x128xf32>, vector<1x128xf32> -> vector<1x128xf32>
    %86 = arith.addf %80, %85 : vector<1x128xf32>
    %c11 = arith.constant 11 : index
    %c0_84 = arith.constant 0 : index
    %87 = vector.load %arg12[%c11, %c0_84] : memref<21x21xf32, #tpu.memory_space<vmem>>, vector<1x21xf32>
    %c11_85 = arith.constant 11 : index
    %c0_86 = arith.constant 0 : index
    %c0_87 = arith.constant 0 : index
    %88 = vector.load %arg4[%c11_85, %c0_86, %c0_87] : memref<21x21x128xbf16, #tpu.memory_space<vmem>>, vector<1x21x128xbf16>
    %89 = vector.shape_cast %88 : vector<1x21x128xbf16> to vector<21x128xbf16>
    %90 = arith.extf %89 : vector<21x128xbf16> to vector<21x128xf32>
    %cst_88 = arith.constant dense<0.000000e+00> : vector<1x128xf32>
    %91 = tpu.matmul %87, %90, %cst_88 {dimension_numbers = #tpu.dot_dimension_numbers<[1], [0], [0], [1], [0, 0, 1, 1], [], []>} : vector<1x21xf32>, vector<21x128xf32>, vector<1x128xf32> -> vector<1x128xf32>
    %92 = arith.addf %86, %91 : vector<1x128xf32>
    %c12 = arith.constant 12 : index
    %c0_89 = arith.constant 0 : index
    %93 = vector.load %arg12[%c12, %c0_89] : memref<21x21xf32, #tpu.memory_space<vmem>>, vector<1x21xf32>
    %c12_90 = arith.constant 12 : index
    %c0_91 = arith.constant 0 : index
    %c0_92 = arith.constant 0 : index
    %94 = vector.load %arg4[%c12_90, %c0_91, %c0_92] : memref<21x21x128xbf16, #tpu.memory_space<vmem>>, vector<1x21x128xbf16>
    %95 = vector.shape_cast %94 : vector<1x21x128xbf16> to vector<21x128xbf16>
    %96 = arith.extf %95 : vector<21x128xbf16> to vector<21x128xf32>
    %cst_93 = arith.constant dense<0.000000e+00> : vector<1x128xf32>
    %97 = tpu.matmul %93, %96, %cst_93 {dimension_numbers = #tpu.dot_dimension_numbers<[1], [0], [0], [1], [0, 0, 1, 1], [], []>} : vector<1x21xf32>, vector<21x128xf32>, vector<1x128xf32> -> vector<1x128xf32>
    %98 = arith.addf %92, %97 : vector<1x128xf32>
    %c13 = arith.constant 13 : index
    %c0_94 = arith.constant 0 : index
    %99 = vector.load %arg12[%c13, %c0_94] : memref<21x21xf32, #tpu.memory_space<vmem>>, vector<1x21xf32>
    %c13_95 = arith.constant 13 : index
    %c0_96 = arith.constant 0 : index
    %c0_97 = arith.constant 0 : index
    %100 = vector.load %arg4[%c13_95, %c0_96, %c0_97] : memref<21x21x128xbf16, #tpu.memory_space<vmem>>, vector<1x21x128xbf16>
    %101 = vector.shape_cast %100 : vector<1x21x128xbf16> to vector<21x128xbf16>
    %102 = arith.extf %101 : vector<21x128xbf16> to vector<21x128xf32>
    %cst_98 = arith.constant dense<0.000000e+00> : vector<1x128xf32>
    %103 = tpu.matmul %99, %102, %cst_98 {dimension_numbers = #tpu.dot_dimension_numbers<[1], [0], [0], [1], [0, 0, 1, 1], [], []>} : vector<1x21xf32>, vector<21x128xf32>, vector<1x128xf32> -> vector<1x128xf32>
    %104 = arith.addf %98, %103 : vector<1x128xf32>
    %c14 = arith.constant 14 : index
    %c0_99 = arith.constant 0 : index
    %105 = vector.load %arg12[%c14, %c0_99] : memref<21x21xf32, #tpu.memory_space<vmem>>, vector<1x21xf32>
    %c14_100 = arith.constant 14 : index
    %c0_101 = arith.constant 0 : index
    %c0_102 = arith.constant 0 : index
    %106 = vector.load %arg4[%c14_100, %c0_101, %c0_102] : memref<21x21x128xbf16, #tpu.memory_space<vmem>>, vector<1x21x128xbf16>
    %107 = vector.shape_cast %106 : vector<1x21x128xbf16> to vector<21x128xbf16>
    %108 = arith.extf %107 : vector<21x128xbf16> to vector<21x128xf32>
    %cst_103 = arith.constant dense<0.000000e+00> : vector<1x128xf32>
    %109 = tpu.matmul %105, %108, %cst_103 {dimension_numbers = #tpu.dot_dimension_numbers<[1], [0], [0], [1], [0, 0, 1, 1], [], []>} : vector<1x21xf32>, vector<21x128xf32>, vector<1x128xf32> -> vector<1x128xf32>
    %110 = arith.addf %104, %109 : vector<1x128xf32>
    %c15 = arith.constant 15 : index
    %c0_104 = arith.constant 0 : index
    %111 = vector.load %arg12[%c15, %c0_104] : memref<21x21xf32, #tpu.memory_space<vmem>>, vector<1x21xf32>
    %c15_105 = arith.constant 15 : index
    %c0_106 = arith.constant 0 : index
    %c0_107 = arith.constant 0 : index
    %112 = vector.load %arg4[%c15_105, %c0_106, %c0_107] : memref<21x21x128xbf16, #tpu.memory_space<vmem>>, vector<1x21x128xbf16>
    %113 = vector.shape_cast %112 : vector<1x21x128xbf16> to vector<21x128xbf16>
    %114 = arith.extf %113 : vector<21x128xbf16> to vector<21x128xf32>
    %cst_108 = arith.constant dense<0.000000e+00> : vector<1x128xf32>
    %115 = tpu.matmul %111, %114, %cst_108 {dimension_numbers = #tpu.dot_dimension_numbers<[1], [0], [0], [1], [0, 0, 1, 1], [], []>} : vector<1x21xf32>, vector<21x128xf32>, vector<1x128xf32> -> vector<1x128xf32>
    %116 = arith.addf %110, %115 : vector<1x128xf32>
    %c16 = arith.constant 16 : index
    %c0_109 = arith.constant 0 : index
    %117 = vector.load %arg12[%c16, %c0_109] : memref<21x21xf32, #tpu.memory_space<vmem>>, vector<1x21xf32>
    %c16_110 = arith.constant 16 : index
    %c0_111 = arith.constant 0 : index
    %c0_112 = arith.constant 0 : index
    %118 = vector.load %arg4[%c16_110, %c0_111, %c0_112] : memref<21x21x128xbf16, #tpu.memory_space<vmem>>, vector<1x21x128xbf16>
    %119 = vector.shape_cast %118 : vector<1x21x128xbf16> to vector<21x128xbf16>
    %120 = arith.extf %119 : vector<21x128xbf16> to vector<21x128xf32>
    %cst_113 = arith.constant dense<0.000000e+00> : vector<1x128xf32>
    %121 = tpu.matmul %117, %120, %cst_113 {dimension_numbers = #tpu.dot_dimension_numbers<[1], [0], [0], [1], [0, 0, 1, 1], [], []>} : vector<1x21xf32>, vector<21x128xf32>, vector<1x128xf32> -> vector<1x128xf32>
    %122 = arith.addf %116, %121 : vector<1x128xf32>
    %c17 = arith.constant 17 : index
    %c0_114 = arith.constant 0 : index
    %123 = vector.load %arg12[%c17, %c0_114] : memref<21x21xf32, #tpu.memory_space<vmem>>, vector<1x21xf32>
    %c17_115 = arith.constant 17 : index
    %c0_116 = arith.constant 0 : index
    %c0_117 = arith.constant 0 : index
    %124 = vector.load %arg4[%c17_115, %c0_116, %c0_117] : memref<21x21x128xbf16, #tpu.memory_space<vmem>>, vector<1x21x128xbf16>
    %125 = vector.shape_cast %124 : vector<1x21x128xbf16> to vector<21x128xbf16>
    %126 = arith.extf %125 : vector<21x128xbf16> to vector<21x128xf32>
    %cst_118 = arith.constant dense<0.000000e+00> : vector<1x128xf32>
    %127 = tpu.matmul %123, %126, %cst_118 {dimension_numbers = #tpu.dot_dimension_numbers<[1], [0], [0], [1], [0, 0, 1, 1], [], []>} : vector<1x21xf32>, vector<21x128xf32>, vector<1x128xf32> -> vector<1x128xf32>
    %128 = arith.addf %122, %127 : vector<1x128xf32>
    %c18 = arith.constant 18 : index
    %c0_119 = arith.constant 0 : index
    %129 = vector.load %arg12[%c18, %c0_119] : memref<21x21xf32, #tpu.memory_space<vmem>>, vector<1x21xf32>
    %c18_120 = arith.constant 18 : index
    %c0_121 = arith.constant 0 : index
    %c0_122 = arith.constant 0 : index
    %130 = vector.load %arg4[%c18_120, %c0_121, %c0_122] : memref<21x21x128xbf16, #tpu.memory_space<vmem>>, vector<1x21x128xbf16>
    %131 = vector.shape_cast %130 : vector<1x21x128xbf16> to vector<21x128xbf16>
    %132 = arith.extf %131 : vector<21x128xbf16> to vector<21x128xf32>
    %cst_123 = arith.constant dense<0.000000e+00> : vector<1x128xf32>
    %133 = tpu.matmul %129, %132, %cst_123 {dimension_numbers = #tpu.dot_dimension_numbers<[1], [0], [0], [1], [0, 0, 1, 1], [], []>} : vector<1x21xf32>, vector<21x128xf32>, vector<1x128xf32> -> vector<1x128xf32>
    %134 = arith.addf %128, %133 : vector<1x128xf32>
    %c19 = arith.constant 19 : index
    %c0_124 = arith.constant 0 : index
    %135 = vector.load %arg12[%c19, %c0_124] : memref<21x21xf32, #tpu.memory_space<vmem>>, vector<1x21xf32>
    %c19_125 = arith.constant 19 : index
    %c0_126 = arith.constant 0 : index
    %c0_127 = arith.constant 0 : index
    %136 = vector.load %arg4[%c19_125, %c0_126, %c0_127] : memref<21x21x128xbf16, #tpu.memory_space<vmem>>, vector<1x21x128xbf16>
    %137 = vector.shape_cast %136 : vector<1x21x128xbf16> to vector<21x128xbf16>
    %138 = arith.extf %137 : vector<21x128xbf16> to vector<21x128xf32>
    %cst_128 = arith.constant dense<0.000000e+00> : vector<1x128xf32>
    %139 = tpu.matmul %135, %138, %cst_128 {dimension_numbers = #tpu.dot_dimension_numbers<[1], [0], [0], [1], [0, 0, 1, 1], [], []>} : vector<1x21xf32>, vector<21x128xf32>, vector<1x128xf32> -> vector<1x128xf32>
    %140 = arith.addf %134, %139 : vector<1x128xf32>
    %c20 = arith.constant 20 : index
    %c0_129 = arith.constant 0 : index
    %141 = vector.load %arg12[%c20, %c0_129] : memref<21x21xf32, #tpu.memory_space<vmem>>, vector<1x21xf32>
    %c20_130 = arith.constant 20 : index
    %c0_131 = arith.constant 0 : index
    %c0_132 = arith.constant 0 : index
    %142 = vector.load %arg4[%c20_130, %c0_131, %c0_132] : memref<21x21x128xbf16, #tpu.memory_space<vmem>>, vector<1x21x128xbf16>
    %143 = vector.shape_cast %142 : vector<1x21x128xbf16> to vector<21x128xbf16>
    %144 = arith.extf %143 : vector<21x128xbf16> to vector<21x128xf32>
    %cst_133 = arith.constant dense<0.000000e+00> : vector<1x128xf32>
    %145 = tpu.matmul %141, %144, %cst_133 {dimension_numbers = #tpu.dot_dimension_numbers<[1], [0], [0], [1], [0, 0, 1, 1], [], []>} : vector<1x21xf32>, vector<21x128xf32>, vector<1x128xf32> -> vector<1x128xf32>
    %146 = arith.addf %140, %145 : vector<1x128xf32>
    %cst_134 = arith.constant 0.000000e+00 : f32
    %147 = vector.broadcast %cst_134 : f32 to vector<1x128xf32>
    %148 = arith.maximumf %146, %147 : vector<1x128xf32>
    %c0_135 = arith.constant 0 : index
    %c0_136 = arith.constant 0 : index
    %149 = vector.load %arg5[%c0_135, %c0_136] : memref<128x64xbf16, #tpu.memory_space<vmem>>, vector<128x64xbf16>
    %150 = arith.extf %149 : vector<128x64xbf16> to vector<128x64xf32>
    %cst_137 = arith.constant dense<0.000000e+00> : vector<1x64xf32>
    %151 = tpu.matmul %148, %150, %cst_137 {dimension_numbers = #tpu.dot_dimension_numbers<[1], [0], [0], [1], [0, 0, 1, 1], [], []>} : vector<1x128xf32>, vector<128x64xf32>, vector<1x64xf32> -> vector<1x64xf32>
    %152 = arith.addf %151, %3 : vector<1x64xf32>
    %cst_138 = arith.constant 0.000000e+00 : f32
    %153 = vector.broadcast %cst_138 : f32 to vector<1x64xf32>
    %154 = arith.maximumf %152, %153 : vector<1x64xf32>
    %c0_139 = arith.constant 0 : index
    %c0_140 = arith.constant 0 : index
    %155 = vector.load %arg6[%c0_139, %c0_140] : memref<64x256xbf16, #tpu.memory_space<vmem>>, vector<64x256xbf16>
    %156 = arith.extf %155 : vector<64x256xbf16> to vector<64x256xf32>
    %cst_141 = arith.constant dense<0.000000e+00> : vector<1x256xf32>
    %157 = tpu.matmul %154, %156, %cst_141 {dimension_numbers = #tpu.dot_dimension_numbers<[1], [0], [0], [1], [0, 0, 1, 1], [], []>} : vector<1x64xf32>, vector<64x256xf32>, vector<1x256xf32> -> vector<1x256xf32>
    %158 = arith.addf %157, %4 : vector<1x256xf32>
    %cst_142 = arith.constant 0.000000e+00 : f32
    %159 = vector.broadcast %cst_142 : f32 to vector<1x256xf32>
    %160 = arith.maximumf %158, %159 : vector<1x256xf32>
    %c0_143 = arith.constant 0 : index
    %c0_144 = arith.constant 0 : index
    %161 = vector.load %arg7[%c0_143, %c0_144] : memref<256x64xbf16, #tpu.memory_space<vmem>>, vector<256x64xbf16>
    %162 = arith.extf %161 : vector<256x64xbf16> to vector<256x64xf32>
    %cst_145 = arith.constant dense<0.000000e+00> : vector<1x64xf32>
    %163 = tpu.matmul %160, %162, %cst_145 {dimension_numbers = #tpu.dot_dimension_numbers<[1], [0], [0], [1], [0, 0, 1, 1], [], []>} : vector<1x256xf32>, vector<256x64xf32>, vector<1x64xf32> -> vector<1x64xf32>
    %164 = arith.addf %163, %5 : vector<1x64xf32>
    %cst_146 = arith.constant 0.000000e+00 : f32
    %165 = vector.broadcast %cst_146 : f32 to vector<1x64xf32>
    %166 = arith.maximumf %164, %165 : vector<1x64xf32>
    %c0_147 = arith.constant 0 : index
    %c0_148 = arith.constant 0 : index
    %167 = vector.load %arg8[%c0_147, %c0_148] : memref<64x6xf32, #tpu.memory_space<vmem>>, vector<64x6xf32>
    %cst_149 = arith.constant dense<0.000000e+00> : vector<1x6xf32>
    %168 = tpu.matmul %154, %167, %cst_149 {dimension_numbers = #tpu.dot_dimension_numbers<[1], [0], [0], [1], [0, 0, 1, 1], [], []>} : vector<1x64xf32>, vector<64x6xf32>, vector<1x6xf32> -> vector<1x6xf32>
    %169 = arith.addf %168, %6 : vector<1x6xf32>
    %c0_150 = arith.constant 0 : index
    %c0_151 = arith.constant 0 : index
    %170 = vector.load %arg9[%c0_150, %c0_151] : memref<64x1xf32, #tpu.memory_space<vmem>>, vector<64x1xf32>
    %cst_152 = arith.constant dense<0.000000e+00> : vector<1x1xf32>
    %171 = tpu.matmul %166, %170, %cst_152 {dimension_numbers = #tpu.dot_dimension_numbers<[1], [0], [0], [1], [0, 0, 1, 1], [], []>} : vector<1x64xf32>, vector<64x1xf32>, vector<1x1xf32> -> vector<1x1xf32>
    %172 = arith.addf %171, %7 : vector<1x1xf32>
    %cst_153 = arith.constant 0.000000e+00 : f32
    %173 = vector.broadcast %cst_153 : f32 to vector<8x128xf32>
    %c0_154 = arith.constant 0 : index
    %c0_155 = arith.constant 0 : index
    %174 = vector.load %arg11[%c0_154, %c0_155] : memref<8x128xf32, #tpu.memory_space<vmem>>, vector<8x128xf32>
    tpu.vector_store %arg11[%c0_154, %c0_155], %173 {strides = array<i32>} : memref<8x128xf32, #tpu.memory_space<vmem>>, vector<8x128xf32>,
    %c0_156 = arith.constant 0 : index
    %c0_157 = arith.constant 0 : index
    %175 = vector.load %arg11[%c0_156, %c0_157] : memref<8x128xf32, #tpu.memory_space<vmem>>, vector<1x6xf32>
    tpu.vector_store %arg11[%c0_156, %c0_157], %169 {strides = array<i32>} : memref<8x128xf32, #tpu.memory_space<vmem>>, vector<1x6xf32>,
    %c1_158 = arith.constant 1 : index
    %c0_159 = arith.constant 0 : index
    %176 = vector.load %arg11[%c1_158, %c0_159] : memref<8x128xf32, #tpu.memory_space<vmem>>, vector<1x1xf32>
    tpu.vector_store %arg11[%c1_158, %c0_159], %172 {strides = array<i32>} : memref<8x128xf32, #tpu.memory_space<vmem>>, vector<1x1xf32>,
    return
  }
}

</mosaic_0001>

<bundles_post_ra>
// kernel: graph_actor_critic_forward.1
= control target key start
LH: loop header
LB: loop body
LE: loop exit
PB: predicated region body
PF: predicated region fallthrough
CT: control target
= control target key end

     0   :  { %v3764_v0 = vmov 0.0|0.0   ;;  %vm3765_vm0 = vmmov 0   ;;  %v3766_v3 = vmov 0.0   ;;  %vm63_vm1 = vcmask 1044480   ;;  %s4366_s1 = inlined_call_operand.vmem [shape: f32[21,8], index: 1, kind: input, shape index: {}]   ;;  %s4367_s2 = inlined_call_operand.vmem [shape: f32[8,21], index: 2, kind: input, shape index: {}]   ;;  %s4368_s0 = inlined_call_operand.vmem [shape: f32[21,21], index: 0, kind: input, shape index: {}]   ;;  %s4369_s3 = inlined_call_operand.vmem [shape: f32[21,21], index: 3, kind: input, shape index: {}]   ;;  %s4370_s10 = inlined_call_operand.vmem [shape: f32[8,256], index: 10, kind: input, shape index: {}]   ;;  %s4371_s4 = inlined_call_operand.vmem [shape: bf16[21,21,128], index: 4, kind: input, shape index: {}]   ;;  %s4372_s5 = inlined_call_operand.vmem [shape: bf16[128,64], index: 5, kind: input, shape index: {}]   ;;  %s4373_s6 = inlined_call_operand.vmem [shape: bf16[64,256], index: 6, kind: input, shape index: {}]   ;;  %s4374_s7 = inlined_call_operand.vmem [shape: bf16[256,64], index: 7, kind: input, shape index: {}]   ;;  %s4375_s8 = inlined_call_operand.vmem [shape: f32[64,6], index: 8, kind: input, shape index: {}]   ;;  %s4376_s9 = inlined_call_operand.vmem [shape: f32[64,1], index: 9, kind: input, shape index: {}]   ;;  %s4377_s11 = inlined_call_operand.vmem [shape: f32[8,128], index: 11, kind: output, shape index: {}]  }
   0x1   :  { %3510 = vmatprep.subr.bf16.mxu0 %v3764_v0  ;;  %v50_v1 = vld [vmem:[%s4366_s1] sm:$0xff]  ;;  %v51_v2 = vld [vmem:[%s4366_s1 + $0x8] sm:$0xff]  ;;  %3198 = vmatprep.mubr.msk.f32.mxu0 %vm3765_vm0, %v3766_v3  ;;  %v52_v6 = vld [vmem:[%s4366_s1 + $0x10] sm:$0x1f]  ;;  %vm53_vm2 = vcmask 171008   ;;  %vm148_vm3 = vcmask 64512   ;;  %2714 = vst [vmem:[%s4377_s11] sm:$0xff] %v3766_v3 }
   0x2   :  { %v3511_v4 = vpack.c.bf16 %v51_v2, %v50_v1  ;;  %3678 = vmatprep.subr.mxu1 %v3766_v3  ;;  %3215 = vmatprep.mubr.msk.f32.mxu1 %vm3765_vm0, %v3766_v3  ;;  %v147_v5 = vld [vmem:[%s4367_s2] sm:$0xff]  ;;  %v48_v8 = vld [vmem:[%s4368_s0 + $0x8] sm:$0xff]  ;;  %v49_v9 = vld [vmem:[%s4368_s0 + $0x10] sm:$0x1f]  ;;  %vm418_vm4 = vcmask 167936   ;;  %vm2343_vm5 = vcmask 523264  }
   0x3   :  { %3679 = vmatpush3.msra.mxu1 %v147_v5  ;;  %v47_v7 = vld [vmem:[%s4368_s0] sm:$0xff]  ;;  %v322_v17 = vld [vmem:[%s4369_s3 + $0x8] sm:$0xff]  ;;  %v323_v19 = vld [vmem:[%s4369_s3 + $0x10] sm:$0x1f]  ;;  %vm2715_vm6 = vcmask 40960   ;;  %vm2717_vm7 = vcmask 0  }
   0x4   :  { %3512 = vmatpush3.bf16.msra.mxu0 %v3511_v4  ;;  %3513 = vmatprep.subr.bf16.mxu1 %v3764_v0  ;;  %v321_v16 = vld [vmem:[%s4369_s3] sm:$0xff]  ;;  %v423_v38 = vld [vmem:[%s4371_s4 + $0x8] sm:$0x7]  ;;  %v3742_v47 = vld [vmem:[%s4371_s4 + $0xc] sm:$0xff]  }
   0x5   :  { %3196 = vmatprep.subr.mxu0 %v3766_v3  ;;  %v3517_v18 = vpack.c.bf16 %v322_v17, %v321_v16  ;;  %v38_v22 = vld [vmem:[%s4370_s10] ss:$0 sm:$0xff]  ;;  %v426_v39 = vunpack.c.l.bf16 %v423_v38  ;;  %v39_v40 = vld [vmem:[%s4370_s10 + $0x1] ss:$0 sm:$0xff]  ;;  %v2743_v49 = vld [vmem:[%s4371_s4 + $0x14] sm:$0x7] }
   0x6   :  { %v2845_v37 = vld [vmem:[%s4371_s4] sm:$0xff]   ;;  %v511_v53 = vunpack.c.l.bf16 %v2743_v49  ;;  %v2984_v54 = vld [vmem:[%s4371_s4 + $0x18] sm:$0xff]   ;;  %v2753_v59 = vld [vmem:[%s4371_s4 + $0x2c] sm:$0x7] }
   0x7   :  { %v2748_v55 = vld [vmem:[%s4371_s4 + $0x20] sm:$0x7]  ;;  %v3743_v58 = vld [vmem:[%s4371_s4 + $0x24] sm:$0xff]   ;;  %v681_v61 = vunpack.c.l.bf16 %v2753_v59  ;;  %v2985_v62 = vld [vmem:[%s4371_s4 + $0x30] sm:$0xff]  }
   0x8   :  { %3197 = vmatpush3.msk.msra.mxu0 %vm63_vm1, %v52_v6  ;;  %v596_v57 = vunpack.c.l.bf16 %v2748_v55  ;;  %v2758_v63 = vld [vmem:[%s4371_s4 + $0x38] sm:$0x7]  ;;  %v3744_v4 = vld [vmem:[%s4371_s4 + $0x3c] sm:$0xff]  }
   0x9   :  { %3199 = vmatmul.mubr.msk.f32.vlgmr.msra.gmra.mrb[0].mxu0 %vm53_vm2, %v47_v7  ;;  %3207 = vmatprep.subr.mxu0 %v3766_v3  ;;  %v766_v2 = vunpack.c.l.bf16 %v2758_v63  ;;  %v3745_v16 = vld [vmem:[%s4371_s4 + $0x54] sm:$0xff]   ;;  %v2773_v17 = vld [vmem:[%s4371_s4 + $0x5c] sm:$0x7]  ;;  %v2991_v55 = vld [vmem:[%s4371_s4 + $0xc0] sm:$0xff]  }
   0xa   :  { %3201 = vmatprep.mubr.msk.f32.mxu0 %vm3765_vm0, %v3766_v3  ;;  %3208 = vmatpush3.msra.mxu0 %v147_v5  ;;  %v2763_v5 = vld [vmem:[%s4371_s4 + $0x44] sm:$0x7]  ;;  %v2992_v63 = vld [vmem:[%s4371_s4 + $0xd8] sm:$0xff]  }
   0xb   :  { %3516 = vmatprep.subr.bf16.mxu0 %v3764_v0 }
   0xd   :  { %3202 = vmatmul.mubr.msk.f32.gmra.mrb[2].mxu0 %vm53_vm2, %v48_v8 }
   0xe   :  { %3204 = vmatprep.mubr.msk.f32.mxu0 %vm3765_vm0, %v3766_v3 }
  0x11   :  { %3205 = vmatmul.mubr.msk.f32.gmra.mrb[4].mxu0 %vm53_vm2, %v49_v9 }
  0x12   :  { %3209 = vmatprep.mubr.msk.f32.mxu0 %vm3765_vm0, %v3766_v3 }
  0xdc   :  { %v133_v10 = vpop.f32.mrb[0].mxu0 }
  0xdd   :  { %v3200_v11 = vpop.f32.mrb[1].mxu0  ;;  %3210 = vmatmul.mubr.msk.f32.vlgmr.msra.gmra.mrb[6].mxu0 %vm148_vm3, %v133_v10  ;;  %v2986_v10 = vld [vmem:[%s4371_s4 + $0x48] sm:$0xff]  }
  0xde   :  { %3212 = vmatprep.mubr.msk.f32.mxu0 %vm3765_vm0, %v3766_v3  ;;  %3518 = vmatpush3.bf16.msra.mxu0 %v3517_v18  ;;  %v2768_v11 = vld [vmem:[%s4371_s4 + $0x50] sm:$0x7] }
  0xdf   :  { %3237 = vmatprep.subr.mxu0 %v3766_v3 }
  0xe0   :  { %v138_v12 = vpop.f32.mrb[2].mxu0 }
  0xe1   :  { %v3203_v13 = vpop.f32.mrb[3].mxu0  ;;  %3213 = vmatmul.mubr.msk.f32.gmra.mrb[8].mxu0 %vm148_vm3, %v138_v12 }
  0xe2   :  { %3239 = vmatprep.mubr.msk.f32.mxu0 %vm3765_vm0, %v3766_v3  ;;  %3238 = vmatpush3.msk.msra.mxu0 %vm63_vm1, %v323_v19  ;;  %v2995_v13 = vld [vmem:[%s4372_s5 + $0x10] sm:$0xff]   ;;  %v2997_v19 = vld [vmem:[%s4372_s5 + $0x20] sm:$0xff]  }
  0xe3   :  { %3582 = vmatprep.subr.bf16.mxu0 %v3764_v0 }
  0xe4   :  { %v143_v14 = vpop.f32.mrb[4].mxu0 }
  0xe5   :  { %v3206_v15 = vpop.f32.mrb[5].mxu0  ;;  %3216 = vmatmul.mubr.msk.f32.vlgmr.msra.gmra.mrb[0].mxu1 %vm148_vm3, %v143_v14  ;;  %v936_v14 = vunpack.c.l.bf16 %v2768_v11 }
  0xe6   :  { %3224 = vmatprep.mubr.msk.f32.mxu1 %vm3765_vm0, %v3766_v3  ;;  %v2996_v15 = vld [vmem:[%s4372_s5 + $0x18] sm:$0xff]  }
 0x1b0   :  { %v224_v20 = vpop.f32.mrb[6].mxu0 }
 0x1b1   :  { %v3211_v21 = vpop.f32.mrb[7].mxu0  ;;  %v225_v24 = vadd.f32 %v224_v20, %v38_v22  ;;  %v1021_v20 = vunpack.c.l.bf16 %v2773_v17 }
 0x1b2   :  { %v2998_v21 = vld [vmem:[%s4372_s5 + $0x28] sm:$0xff]  }
 0x1b4   :  { %v229_v23 = vpop.f32.mrb[8].mxu0 }
 0x1b5   :  { %v230_v25 = vadd.f32 %v229_v23, %v38_v22  ;;  %v3214_v26 = vpop.f32.mrb[9].mxu0  ;;  %v2778_v23 = vld [vmem:[%s4371_s4 + $0x68] sm:$0x7] }
 0x1b6   :  { %v1106_v26 = vunpack.c.l.bf16 %v2778_v23  ;;  %v3757_v23 = vld [vmem:[%s4373_s6 + $0x10] ss:$8 sps:$4 sm:$0xff]  }
 0x1b7   :  { %v3514_v27 = vpack.c.bf16 %v230_v25, %v225_v24  ;;  %v2999_v25 = vld [vmem:[%s4372_s5 + $0x30] sm:$0xff]  }
 0x1b8   :  { %v234_v28 = vpop.f32.mrb[0].mxu1 }
 0x1b9   :  { %v235_v29 = vadd.f32 %v234_v28, %v38_v22  ;;  %3515 = vmatpush3.bf16.msra.mxu1 %v3514_v27  ;;  %v3217_v30 = vpop.f32.mrb[1].mxu1  ;;  %v2987_v22 = vld [vmem:[%s4371_s4 + $0x60] sm:$0xff]   ;;  %v3746_v28 = vld [vmem:[%s4371_s4 + $0x6c] sm:$0xff]  }
 0x1ba   :  { %3222 = vmatprep.subr.mxu1 %v3766_v3 }
 0x1bd   :  { %3223 = vmatpush3.msk.msra.mxu1 %vm63_vm1, %v235_v29  ;;  %v2783_v29 = vld [vmem:[%s4371_s4 + $0x74] sm:$0x7] }
 0x1be   :  { %3225 = vmatmul.mubr.msk.f32.vlgmr.msra.gmra.mrb[2].mxu1 %vm53_vm2, %v47_v7  ;;  %3519 = vmatprep.subr.bf16.mxu1 %v3764_v0  ;;  %v851_v7 = vunpack.c.l.bf16 %v2763_v5  ;;  %v1191_v30 = vunpack.c.l.bf16 %v2783_v29  ;;  %v3751_v5 = vld [vmem:[%s4371_s4 + $0xe4] sm:$0xff]   ;;  %v41_v29 = vld [vmem:[%s4370_s10 + $0x3] ss:$0 sm:$0xff] }
 0x1bf   :  { %3227 = vmatprep.mubr.msk.f32.mxu1 %vm3765_vm0, %v3766_v3  ;;  %3521 = vmatpush3.bf16.msra.mxu1 %v2845_v37 }
 0x1c0   :  { %3252 = vmatprep.subr.mxu1 %v3766_v3 }
 0x1c2   :  { %3228 = vmatmul.mubr.msk.f32.gmra.mrb[4].mxu1 %vm53_vm2, %v48_v8  ;;  %v2889_v8 = vld [vmem:[%s4372_s5] sm:$0xff]  }
 0x1c3   :  { %3230 = vmatprep.mubr.msk.f32.mxu1 %vm3765_vm0, %v3766_v3  ;;  %3253 = vmatpush3.msk.msra.mxu1 %vm63_vm1, %v426_v39  ;;  %v2989_v39 = vld [vmem:[%s4371_s4 + $0x90] sm:$0xff]  }
 0x1c4   :  { %3522 = vmatprep.subr.bf16.mxu1 %v3764_v0 }
 0x1c6   :  { %3231 = vmatmul.mubr.msk.f32.gmra.mrb[6].mxu1 %vm53_vm2, %v49_v9  ;;  %v2994_v9 = vld [vmem:[%s4372_s5 + $0x8] sm:$0xff]  }
 0x1c7   :  { %3254 = vmatprep.mubr.msk.f32.mxu1 %vm3765_vm0, %v3766_v3 }
 0x291   :  { %v307_v31 = vpop.f32.mrb[2].mxu1 }
 0x292   :  { %v3226_v32 = vpop.f32.mrb[3].mxu1  ;;  %3240 = vmatmul.mubr.msk.f32.vlgmr.msra.gmra.mrb[10].mxu0 %vm53_vm2, %v307_v31  ;;  %v2988_v31 = vld [vmem:[%s4371_s4 + $0x78] sm:$0xff]  }
 0x293   :  { %3242 = vmatprep.mubr.msk.f32.mxu0 %vm3765_vm0, %v3766_v3  ;;  %3584 = vmatpush3.bf16.msra.mxu0 %v2889_v8  ;;  %v2788_v32 = vld [vmem:[%s4371_s4 + $0x80] sm:$0x7] }
 0x294   :  { %3585 = vmatprep.subr.bf16.mxu0 %v3764_v0 }
 0x295   :  { %v312_v33 = vpop.f32.mrb[4].mxu1 }
 0x296   :  { %v3229_v34 = vpop.f32.mrb[5].mxu1  ;;  %3243 = vmatmul.mubr.msk.f32.gmra.mrb[12].mxu0 %vm53_vm2, %v312_v33 }
 0x297   :  { %3245 = vmatprep.mubr.msk.f32.mxu0 %vm3765_vm0, %v3766_v3  ;;  %3587 = vmatpush3.bf16.msra.mxu0 %v2994_v9  ;;  %v1276_v34 = vunpack.c.l.bf16 %v2788_v32  ;;  %v2993_v9 = vld [vmem:[%s4371_s4 + $0xf0] sm:$0xff]  }
 0x298   :  { %3588 = vmatprep.subr.bf16.mxu0 %v3764_v0 }
 0x299   :  { %v317_v35 = vpop.f32.mrb[6].mxu1 }
 0x29a   :  { %v3232_v36 = vpop.f32.mrb[7].mxu1  ;;  %3246 = vmatmul.mubr.msk.f32.gmra.mrb[14].mxu0 %vm53_vm2, %v317_v35  ;;  %v3747_v35 = vld [vmem:[%s4371_s4 + $0x84] sm:$0xff]  }
 0x29b   :  { %3469 = vmatprep.mubr.msk.f32.mxu0 %vm3765_vm0, %v3766_v3  ;;  %3590 = vmatpush3.bf16.msra.mxu0 %v2995_v13  ;;  %v2793_v36 = vld [vmem:[%s4371_s4 + $0x8c] sm:$0x7] }
 0x29c   :  { %3591 = vmatprep.subr.bf16.mxu0 %v3764_v0  ;;  %v1361_v38 = vunpack.c.l.bf16 %v2793_v36  ;;  %v3001_v36 = vld [vmem:[%s4374_s7 + $0x8] sm:$0xff]  }
 0x29f   :  { %3593 = vmatpush3.bf16.msra.mxu0 %v2996_v15  ;;  %v3752_v15 = vld [vmem:[%s4373_s6 + $0x4] ss:$8 sps:$4 sm:$0xff]  }
 0x2a0   :  { %3594 = vmatprep.subr.bf16.mxu0 %v3764_v0 }
 0x2a3   :  { %3596 = vmatpush3.bf16.msra.mxu0 %v2997_v19 }
 0x2a4   :  { %3597 = vmatprep.subr.bf16.mxu0 %v3764_v0 }
 0x2a7   :  { %3599 = vmatpush3.bf16.msra.mxu0 %v2998_v21 }
 0x2a8   :  { %3600 = vmatprep.subr.bf16.mxu0 %v3764_v0 }
 0x2ab   :  { %3602 = vmatpush3.bf16.msra.mxu0 %v2999_v25  ;;  %v3760_v25 = vld [vmem:[%s4373_s6 + $0x20] ss:$8 sps:$4 sm:$0xff]  }
 0x2ac   :  { %3603 = vmatprep.subr.bf16.mxu0 %v3764_v0 }
 0x365   :  { %v402_v41 = vpop.f32.mrb[10].mxu0 }
 0x366   :  { %v403_v42 = vadd.f32 %v402_v41, %v39_v40  ;;  %v3241_v43 = vpop.f32.mrb[11].mxu0 }
 0x367   :  { %v3748_v43 = vld [vmem:[%s4371_s4 + $0x9c] sm:$0xff]  }
 0x368   :  { %416 = vst.msk [vmem:[#allocation2] sm:$0xff] %vm53_vm2, %v403_v42 }
 0x369   :  { %v407_v44 = vpop.f32.mrb[12].mxu0 }
 0x36a   :  { %v408_v45 = vadd.f32 %v407_v44, %v39_v40  ;;  %v3244_v46 = vpop.f32.mrb[13].mxu0  ;;  %v2803_v44 = vld [vmem:[%s4371_s4 + $0xa4] sm:$0x7] }
 0x36b   :  { %v1531_v46 = vunpack.c.l.bf16 %v2803_v44  ;;  %v3005_v44 = vld [vmem:[%s4374_s7 + $0x28] sm:$0xff]  }
 0x36c   :  { %417 = vst.msk [vmem:[#allocation2 + $0x8] sm:$0xff] %vm53_vm2, %v408_v45 }
 0x36d   :  { %v412_v48 = vpop.f32.mrb[14].mxu0 }
 0x36e   :  { %v413_v50 = vadd.f32 %v412_v48, %v39_v40  ;;  %v3247_v51 = vpop.f32.mrb[15].mxu0  ;;  %v2798_v40 = vld [vmem:[%s4371_s4 + $0x98] sm:$0x7]  ;;  %v2808_v48 = vld [vmem:[%s4371_s4 + $0xb0] sm:$0x7] }
 0x36f   :  { %v420_v52 = vld [vmem:[#allocation2] sm:$0x1]  ;;  %v504_v56 = vld [vmem:[#allocation2 + $0x1] sm:$0x1]  ;;  %v589_v60 = vld [vmem:[#allocation2 + $0x2] sm:$0x1]  ;;  %v1446_v42 = vunpack.c.l.bf16 %v2798_v40 }
 0x370   :  { %3255 = vmatmul.mubr.msk.f32.vlgmr.msra.gmra.mrb[8].mxu1 %vm53_vm2, %v420_v52  ;;  %419 = vst.msk [vmem:[#allocation2 + $0x10] sm:$0x1f] %vm418_vm4, %v413_v50  ;;  %v674_v1 = vld [vmem:[#allocation2 + $0x3] sm:$0x1]  ;;  %v759_v6 = vld [vmem:[#allocation2 + $0x4] sm:$0x1]  ;;  %v1616_v50 = vunpack.c.l.bf16 %v2808_v48 }
 0x371   :  { %3524 = vmatpush3.bf16.msra.mxu1 %v3742_v47  ;;  %3263 = vmatprep.mubr.msk.f32.mxu1 %vm3765_vm0, %v3766_v3  ;;  %v844_v12 = vld [vmem:[#allocation2 + $0x5] sm:$0x1]  ;;  %v929_v18 = vld [vmem:[#allocation2 + $0x6] sm:$0x1]  ;;  %v1014_v24 = vld [vmem:[#allocation2 + $0x7] sm:$0x1] }
 0x372   :  { %3261 = vmatprep.subr.mxu1 %v3766_v3  ;;  %v2990_v47 = vld [vmem:[%s4371_s4 + $0xa8] sm:$0xff]   ;;  %v3749_v51 = vld [vmem:[%s4371_s4 + $0xb4] sm:$0xff]   ;;  %v2813_v52 = vld [vmem:[%s4371_s4 + $0xbc] sm:$0x7] }
 0x373   :  { %v1099_v27 = vld [vmem:[#allocation2 + $0x8] sm:$0x1]  ;;  %v1184_v33 = vld [vmem:[#allocation2 + $0x9] sm:$0x1]  ;;  %v1269_v37 = vld [vmem:[#allocation2 + $0xa] sm:$0x1] }
 0x374   :  { %v1354_v41 = vld [vmem:[#allocation2 + $0xb] sm:$0x1]  ;;  %v1439_v45 = vld [vmem:[#allocation2 + $0xc] sm:$0x1]  ;;  %v1524_v49 = vld [vmem:[#allocation2 + $0xd] sm:$0x1] }
 0x375   :  { %3262 = vmatpush3.msk.msra.mxu1 %vm63_vm1, %v511_v53  ;;  %v1609_v53 = vld [vmem:[#allocation2 + $0xe] sm:$0x1]  ;;  %v3003_v40 = vld [vmem:[%s4374_s7 + $0x18] sm:$0xff]  }
 0x376   :  { %3525 = vmatprep.subr.bf16.mxu1 %v3764_v0  ;;  %v3007_v48 = vld [vmem:[%s4374_s7 + $0x38] sm:$0xff]  }
 0x377   :  { %v1779_v59 = vld [vmem:[#allocation2 + $0x10] sm:$0x1]  ;;  %v2034_v11 = vld [vmem:[#allocation2 + $0x13] sm:$0x1]  ;;  %v2119_v13 = vld [vmem:[#allocation2 + $0x14] sm:$0x1] }
 0x378   :  { %3264 = vmatmul.mubr.msk.f32.vlgmr.msra.gmra.mrb[8].mxu1 %vm53_vm2, %v504_v56  ;;  %v2818_v56 = vld [vmem:[%s4371_s4 + $0xc8] sm:$0x7] }
 0x379   :  { %3527 = vmatpush3.bf16.msra.mxu1 %v2984_v54  ;;  %3272 = vmatprep.mubr.msk.f32.mxu1 %vm3765_vm0, %v3766_v3  ;;  %v1701_v54 = vunpack.c.l.bf16 %v2813_v52  ;;  %v2723_v52 = vld [vmem:[%s4370_s10 + $0x4] ss:$8 sm:$0x3] }
 0x37a   :  { %3270 = vmatprep.subr.mxu1 %v3766_v3 }
 0x37d   :  { %3271 = vmatpush3.msk.msra.mxu1 %vm63_vm1, %v596_v57  ;;  %v1694_v57 = vld [vmem:[#allocation2 + $0xf] sm:$0x1] }
 0x37e   :  { %3528 = vmatprep.subr.bf16.mxu1 %v3764_v0 }
 0x380   :  { %3273 = vmatmul.mubr.msk.f32.vlgmr.msra.gmra.mrb[8].mxu1 %vm53_vm2, %v589_v60  ;;  %v3750_v60 = vld [vmem:[%s4371_s4 + $0xcc] sm:$0xff]  }
 0x381   :  { %3530 = vmatpush3.bf16.msra.mxu1 %v3743_v58  ;;  %3281 = vmatprep.mubr.msk.f32.mxu1 %vm3765_vm0, %v3766_v3  ;;  %v1786_v58 = vunpack.c.l.bf16 %v2818_v56 }
 0x382   :  { %3279 = vmatprep.subr.mxu1 %v3766_v3 }
 0x385   :  { %3280 = vmatpush3.msk.msra.mxu1 %vm63_vm1, %v681_v61  ;;  %v2823_v61 = vld [vmem:[%s4371_s4 + $0xd4] sm:$0x7] }
 0x386   :  { %3531 = vmatprep.subr.bf16.mxu1 %v3764_v0 }
 0x388   :  { %3282 = vmatmul.mubr.msk.f32.vlgmr.msra.gmra.mrb[8].mxu1 %vm53_vm2, %v674_v1  ;;  %v2828_v1 = vld [vmem:[%s4371_s4 + $0xe0] sm:$0x7] }
 0x389   :  { %3533 = vmatpush3.bf16.msra.mxu1 %v2985_v62  ;;  %3290 = vmatprep.mubr.msk.f32.mxu1 %vm3765_vm0, %v3766_v3  ;;  %v1871_v62 = vunpack.c.l.bf16 %v2823_v61 }
 0x38a   :  { %3288 = vmatprep.subr.mxu1 %v3766_v3 }
 0x38d   :  { %3289 = vmatpush3.msk.msra.mxu1 %vm63_vm1, %v766_v2  ;;  %v1864_v2 = vld [vmem:[#allocation2 + $0x11] sm:$0x1] }
 0x38e   :  { %3534 = vmatprep.subr.bf16.mxu1 %v3764_v0 }
 0x390   :  { %3291 = vmatmul.mubr.msk.f32.vlgmr.msra.gmra.mrb[8].mxu1 %vm53_vm2, %v759_v6  ;;  %v2833_v6 = vld [vmem:[%s4371_s4 + $0xec] sm:$0x7] }
 0x391   :  { %3536 = vmatpush3.bf16.msra.mxu1 %v3744_v4  ;;  %3299 = vmatprep.mubr.msk.f32.mxu1 %vm3765_vm0, %v3766_v3  ;;  %v1956_v4 = vunpack.c.l.bf16 %v2828_v1  ;;  %v2041_v8 = vunpack.c.l.bf16 %v2833_v6  ;;  %v2559_v6 = vld [vmem:[%s4375_s8 + $0x20] sm:$0xff] }
 0x392   :  { %3297 = vmatprep.subr.mxu1 %v3766_v3 }
 0x395   :  { %3298 = vmatpush3.msk.msra.mxu1 %vm63_vm1, %v851_v7  ;;  %v1949_v7 = vld [vmem:[#allocation2 + $0x12] sm:$0x1] }
 0x396   :  { %3537 = vmatprep.subr.bf16.mxu1 %v3764_v0 }
 0x398   :  { %3300 = vmatmul.mubr.msk.f32.vlgmr.msra.gmra.mrb[8].mxu1 %vm53_vm2, %v844_v12 }
 0x399   :  { %3539 = vmatpush3.bf16.msra.mxu1 %v2986_v10  ;;  %3308 = vmatprep.mubr.msk.f32.mxu1 %vm3765_vm0, %v3766_v3  ;;  %v2838_v10 = vld [vmem:[%s4371_s4 + $0xf8] sm:$0x7] }
 0x39a   :  { %3306 = vmatprep.subr.mxu1 %v3766_v3  ;;  %v2126_v12 = vunpack.c.l.bf16 %v2838_v10  ;;  %v2562_v10 = vld [vmem:[%s4375_s8 + $0x38] sm:$0xff] }
 0x39d   :  { %3307 = vmatpush3.msk.msra.mxu1 %vm63_vm1, %v936_v14  ;;  %v3000_v14 = vld [vmem:[%s4372_s5 + $0x38] sm:$0xff]  }
 0x39e   :  { %3540 = vmatprep.subr.bf16.mxu1 %v3764_v0  ;;  %3605 = vmatpush3.bf16.msra.mxu0 %v3000_v14 }
 0x39f   :  { %3607 = vmatprep.subr.bf16.mxu0 %v3752_v15  ;;  %v2635_v15 = vld [vmem:[%s4376_s9 + $0x10] sm:$0xff] }
 0x3a0   :  { %3309 = vmatmul.mubr.msk.f32.vlgmr.msra.gmra.mrb[8].mxu1 %vm53_vm2, %v929_v18 }
 0x3a1   :  { %3542 = vmatpush3.bf16.msra.mxu1 %v3745_v16  ;;  %3317 = vmatprep.mubr.msk.f32.mxu1 %vm3765_vm0, %v3766_v3  ;;  %v40_v16 = vld [vmem:[%s4370_s10 + $0x2] ss:$0 sm:$0xff] }
 0x3a2   :  { %3315 = vmatprep.subr.mxu1 %v3766_v3 }
 0x3a5   :  { %3316 = vmatpush3.msk.msra.mxu1 %vm63_vm1, %v1021_v20  ;;  %v3754_v20 = vld [vmem:[%s4373_s6] ss:$8 sps:$4 sm:$0xff]  }
 0x3a6   :  { %3543 = vmatprep.subr.bf16.mxu1 %v3764_v0 }
 0x3a8   :  { %3318 = vmatmul.mubr.msk.f32.vlgmr.msra.gmra.mrb[8].mxu1 %vm53_vm2, %v1014_v24  ;;  %v3758_v24 = vld [vmem:[%s4373_s6 + $0x24] ss:$8 sps:$4 sm:$0xff]  }
 0x3a9   :  { %3545 = vmatpush3.bf16.msra.mxu1 %v2987_v22  ;;  %3326 = vmatprep.mubr.msk.f32.mxu1 %vm3765_vm0, %v3766_v3  ;;  %v3755_v22 = vld [vmem:[%s4373_s6 + $0x14] ss:$8 sps:$4 sm:$0xff]  }
 0x3aa   :  { %3324 = vmatprep.subr.mxu1 %v3766_v3 }
 0x3ad   :  { %3325 = vmatpush3.msk.msra.mxu1 %vm63_vm1, %v1106_v26  ;;  %v3761_v26 = vld [vmem:[%s4373_s6 + $0x34] ss:$8 sps:$4 sm:$0xff]  }
 0x3ae   :  { %3546 = vmatprep.subr.bf16.mxu1 %v3764_v0 }
 0x3b0   :  { %3327 = vmatmul.mubr.msk.f32.vlgmr.msra.gmra.mrb[8].mxu1 %vm53_vm2, %v1099_v27  ;;  %v3763_v27 = vld [vmem:[%s4373_s6 + $0x30] ss:$8 sps:$4 sm:$0xff]  }
 0x3b1   :  { %3548 = vmatpush3.bf16.msra.mxu1 %v3746_v28  ;;  %3335 = vmatprep.mubr.msk.f32.mxu1 %vm3765_vm0, %v3766_v3  ;;  %v3008_v28 = vld [vmem:[%s4374_s7 + $0x40] sm:$0xff]  }
 0x3b2   :  { %3333 = vmatprep.subr.mxu1 %v3766_v3 }
 0x3b5   :  { %3334 = vmatpush3.msk.msra.mxu1 %vm63_vm1, %v1191_v30 }
 0x3b6   :  { %3549 = vmatprep.subr.bf16.mxu1 %v3764_v0 }
 0x3b8   :  { %3336 = vmatmul.mubr.msk.f32.vlgmr.msra.gmra.mrb[8].mxu1 %vm53_vm2, %v1184_v33 }
 0x3b9   :  { %3551 = vmatpush3.bf16.msra.mxu1 %v2988_v31  ;;  %3344 = vmatprep.mubr.msk.f32.mxu1 %vm3765_vm0, %v3766_v3 }
 0x3ba   :  { %3342 = vmatprep.subr.mxu1 %v3766_v3 }
 0x3bd   :  { %3343 = vmatpush3.msk.msra.mxu1 %vm63_vm1, %v1276_v34  ;;  %v2921_v34 = vld [vmem:[%s4374_s7] sm:$0xff]  }
 0x3be   :  { %3552 = vmatprep.subr.bf16.mxu1 %v3764_v0 }
 0x3c0   :  { %3345 = vmatmul.mubr.msk.f32.vlgmr.msra.gmra.mrb[8].mxu1 %vm53_vm2, %v1269_v37  ;;  %v3010_v37 = vld [vmem:[%s4374_s7 + $0x50] sm:$0xff]  }
 0x3c1   :  { %3554 = vmatpush3.bf16.msra.mxu1 %v3747_v35  ;;  %3353 = vmatprep.mubr.msk.f32.mxu1 %vm3765_vm0, %v3766_v3  ;;  %v3009_v35 = vld [vmem:[%s4374_s7 + $0x48] sm:$0xff]  }
 0x3c2   :  { %3351 = vmatprep.subr.mxu1 %v3766_v3 }
 0x3c5   :  { %3352 = vmatpush3.msk.msra.mxu1 %vm63_vm1, %v1361_v38  ;;  %v3002_v38 = vld [vmem:[%s4374_s7 + $0x10] sm:$0xff]  }
 0x3c6   :  { %3555 = vmatprep.subr.bf16.mxu1 %v3764_v0 }
 0x3c8   :  { %3354 = vmatmul.mubr.msk.f32.vlgmr.msra.gmra.mrb[8].mxu1 %vm53_vm2, %v1354_v41  ;;  %v3012_v41 = vld [vmem:[%s4374_s7 + $0x60] sm:$0xff]  }
 0x3c9   :  { %3557 = vmatpush3.bf16.msra.mxu1 %v2989_v39  ;;  %3362 = vmatprep.mubr.msk.f32.mxu1 %vm3765_vm0, %v3766_v3  ;;  %v3011_v39 = vld [vmem:[%s4374_s7 + $0x58] sm:$0xff]  }
 0x3ca   :  { %3360 = vmatprep.subr.mxu1 %v3766_v3 }
 0x3cd   :  { %3361 = vmatpush3.msk.msra.mxu1 %vm63_vm1, %v1446_v42  ;;  %v3004_v42 = vld [vmem:[%s4374_s7 + $0x20] sm:$0xff]  }
 0x3ce   :  { %3558 = vmatprep.subr.bf16.mxu1 %v3764_v0 }
 0x3d0   :  { %3363 = vmatmul.mubr.msk.f32.vlgmr.msra.gmra.mrb[8].mxu1 %vm53_vm2, %v1439_v45  ;;  %v3014_v45 = vld [vmem:[%s4374_s7 + $0x70] sm:$0xff]  }
 0x3d1   :  { %3560 = vmatpush3.bf16.msra.mxu1 %v3748_v43  ;;  %3371 = vmatprep.mubr.msk.f32.mxu1 %vm3765_vm0, %v3766_v3  ;;  %v3013_v43 = vld [vmem:[%s4374_s7 + $0x68] sm:$0xff]  }
 0x3d2   :  { %3369 = vmatprep.subr.mxu1 %v3766_v3 }
 0x3d5   :  { %3370 = vmatpush3.msk.msra.mxu1 %vm63_vm1, %v1531_v46  ;;  %v3006_v46 = vld [vmem:[%s4374_s7 + $0x30] sm:$0xff]  }
 0x3d6   :  { %3561 = vmatprep.subr.bf16.mxu1 %v3764_v0 }
 0x3d8   :  { %3372 = vmatmul.mubr.msk.f32.vlgmr.msra.gmra.mrb[8].mxu1 %vm53_vm2, %v1524_v49  ;;  %v2333_v49 = vlaneseq }
 0x3d9   :  { %3563 = vmatpush3.bf16.msra.mxu1 %v2990_v47  ;;  %3380 = vmatprep.mubr.msk.f32.mxu1 %vm3765_vm0, %v3766_v3  ;;  %v3015_v47 = vld [vmem:[%s4374_s7 + $0x78] sm:$0xff]  }
 0x3da   :  { %3378 = vmatprep.subr.mxu1 %v3766_v3 }
 0x3dd   :  { %3379 = vmatpush3.msk.msra.mxu1 %vm63_vm1, %v1616_v50  ;;  %v2334_v50 = vshrl.u32 %v2333_v49, 7 }
 0x3de   :  { %3564 = vmatprep.subr.bf16.mxu1 %v3764_v0 }
 0x3e0   :  { %3381 = vmatmul.mubr.msk.f32.vlgmr.msra.gmra.mrb[8].mxu1 %vm53_vm2, %v1609_v53  ;;  %v2339_v53 = vsub.s32 1, %v2334_v50 }
 0x3e1   :  { %3566 = vmatpush3.bf16.msra.mxu1 %v3749_v51  ;;  %3389 = vmatprep.mubr.msk.f32.mxu1 %vm3765_vm0, %v3766_v3  ;;  %v2335_v51 = vsub.s32 0, %v2334_v50 }
 0x3e2   :  { %3387 = vmatprep.subr.mxu1 %v3766_v3 }
 0x3e5   :  { %3388 = vmatpush3.msk.msra.mxu1 %vm63_vm1, %v1701_v54  ;;  %v2336_v54 = vrot.slane %v2723_v52, %v2335_v51 }
 0x3e6   :  { %3567 = vmatprep.subr.bf16.mxu1 %v3764_v0 }
 0x3e8   :  { %3390 = vmatmul.mubr.msk.f32.vlgmr.msra.gmra.mrb[8].mxu1 %vm53_vm2, %v1694_v57 }
 0x3e9   :  { %3569 = vmatpush3.bf16.msra.mxu1 %v2991_v55  ;;  %3398 = vmatprep.mubr.msk.f32.mxu1 %vm3765_vm0, %v3766_v3  ;;  %v2340_v55 = vrot.slane %v2723_v52, %v2339_v53 }
 0x3ea   :  { %3396 = vmatprep.subr.mxu1 %v3766_v3 }
 0x3ed   :  { %3397 = vmatpush3.msk.msra.mxu1 %vm63_vm1, %v1786_v58 }
 0x3ee   :  { %3570 = vmatprep.subr.bf16.mxu1 %v3764_v0 }
 0x3f0   :  { %3399 = vmatmul.mubr.msk.f32.vlgmr.msra.gmra.mrb[8].mxu1 %vm53_vm2, %v1779_v59  ;;  %v2555_v59 = vld [vmem:[%s4375_s8] sm:$0xff] }
 0x3f1   :  { %3572 = vmatpush3.bf16.msra.mxu1 %v3750_v60  ;;  %3407 = vmatprep.mubr.msk.f32.mxu1 %vm3765_vm0, %v3766_v3  ;;  %v2556_v60 = vld [vmem:[%s4375_s8 + $0x8] sm:$0xff] }
 0x3f2   :  { %3405 = vmatprep.subr.mxu1 %v3766_v3 }
 0x3f5   :  { %3406 = vmatpush3.msk.msra.mxu1 %vm63_vm1, %v1871_v62 }
 0x3f6   :  { %3573 = vmatprep.subr.bf16.mxu1 %v3764_v0 }
 0x3f8   :  { %3408 = vmatmul.mubr.msk.f32.vlgmr.msra.gmra.mrb[8].mxu1 %vm53_vm2, %v1864_v2  ;;  %v2557_v2 = vld [vmem:[%s4375_s8 + $0x10] sm:$0xff] }
 0x3f9   :  { %3575 = vmatpush3.bf16.msra.mxu1 %v2992_v63  ;;  %3416 = vmatprep.mubr.msk.f32.mxu1 %vm3765_vm0, %v3766_v3  ;;  %v3655_v63 = vpack.c.bf16 %v2556_v60, %v2555_v59 }
 0x3fa   :  { %3414 = vmatprep.subr.mxu1 %v3766_v3 }
 0x3fd   :  { %3415 = vmatpush3.msk.msra.mxu1 %vm63_vm1, %v1956_v4  ;;  %v2558_v4 = vld [vmem:[%s4375_s8 + $0x18] sm:$0xff] }
 0x3fe   :  { %3576 = vmatprep.subr.bf16.mxu1 %v3764_v0 }
 0x400   :  { %3417 = vmatmul.mubr.msk.f32.vlgmr.msra.gmra.mrb[8].mxu1 %vm53_vm2, %v1949_v7  ;;  %v2560_v7 = vld [vmem:[%s4375_s8 + $0x28] sm:$0xff] }
 0x401   :  { %3578 = vmatpush3.bf16.msra.mxu1 %v3751_v5  ;;  %3425 = vmatprep.mubr.msk.f32.mxu1 %vm3765_vm0, %v3766_v3  ;;  %v3658_v5 = vpack.c.bf16 %v2558_v4, %v2557_v2 }
 0x402   :  { %3423 = vmatprep.subr.mxu1 %v3766_v3 }
 0x405   :  { %3424 = vmatpush3.msk.msra.mxu1 %vm63_vm1, %v2041_v8  ;;  %v3661_v8 = vpack.c.bf16 %v2560_v7, %v2559_v6 }
 0x406   :  { %3579 = vmatprep.subr.bf16.mxu1 %v3764_v0 }
 0x408   :  { %3426 = vmatmul.mubr.msk.f32.vlgmr.msra.gmra.mrb[8].mxu1 %vm53_vm2, %v2034_v11 }
 0x409   :  { %3581 = vmatpush3.bf16.msra.mxu1 %v2993_v9  ;;  %3434 = vmatprep.mubr.msk.f32.mxu1 %vm3765_vm0, %v3766_v3  ;;  %v2561_v9 = vld [vmem:[%s4375_s8 + $0x30] sm:$0xff] }
 0x40a   :  { %3432 = vmatprep.subr.mxu1 %v3766_v3  ;;  %v3664_v11 = vpack.c.bf16 %v2562_v10, %v2561_v9 }
 0x40d   :  { %3433 = vmatpush3.msk.msra.mxu1 %vm63_vm1, %v2126_v12  ;;  %v2633_v12 = vld [vmem:[%s4376_s9] sm:$0xff] }
 0x410   :  { %3435 = vmatmul.mubr.msk.f32.vlgmr.msra.gmra.mrb[8].mxu1 %vm53_vm2, %v2119_v13  ;;  %v2634_v13 = vld [vmem:[%s4376_s9 + $0x8] sm:$0xff] }
 0x411   :  { %v3667_v14 = vpack.c.bf16 %v2634_v13, %v2633_v12 }
 0x4e3   :  { %v2199_v17 = vpop.f32.mrb[8].mxu1 }
 0x4e4   :  { %v3680_v18 = vadd.f32 %v2199_v17, %v40_v16  ;;  %v3436_v19 = vpop.f32.mrb[9].mxu1  ;;  %v2636_v16 = vld [vmem:[%s4376_s9 + $0x18] sm:$0xff] }
 0x4e5   :  { %v3670_v17 = vpack.c.bf16 %v2636_v16, %v2635_v15  ;;  %v2638_v19 = vld [vmem:[%s4376_s9 + $0x28] sm:$0xff] }
 0x4e6   :  { %v2204_v21 = vmax.f32 %v3680_v18, 0.0  ;;  %v2637_v18 = vld [vmem:[%s4376_s9 + $0x20] sm:$0xff] }
 0x4e8   :  { %3470 = vmatmul.mubr.f32.vlgmr.msra.gmra.mrb[16].mxu0 %v2204_v21  ;;  %v2639_v21 = vld [vmem:[%s4376_s9 + $0x30] sm:$0xff] }
 0x4e9   :  { %3609 = vmatpush1.bf16.msra.mxu0 %v3754_v20  ;;  %2411 = vmatprep.mubr.f32.mxu0 %v3766_v3  ;;  %v3673_v20 = vpack.c.bf16 %v2638_v19, %v2637_v18 }
 0x4ea   :  { %3611 = vmatprep.subr.bf16.mxu0 %v3755_v22  ;;  %v2640_v22 = vld [vmem:[%s4376_s9 + $0x38] sm:$0xff] }
 0x4ed   :  { %3613 = vmatpush1.bf16.msra.mxu0 %v3757_v23  ;;  %v3676_v23 = vpack.c.bf16 %v2640_v22, %v2639_v21 }
 0x4ee   :  { %3615 = vmatprep.subr.bf16.mxu0 %v3758_v24 }
 0x4f1   :  { %3617 = vmatpush1.bf16.msra.mxu0 %v3760_v25 }
 0x4f2   :  { %3619 = vmatprep.subr.bf16.mxu0 %v3761_v26 }
 0x4f5   :  { %3621 = vmatpush1.bf16.msra.mxu0 %v3763_v27 }
 0x4f6   :  { %3623 = vmatprep.subr.bf16.mxu0 %v3008_v28 }
 0x5bb   :  { %v2303_v30 = vpop.f32.mrb[16].mxu0 }
 0x5bc   :  { %v4229_v31 = vadd.f32 %v2303_v30, %v41_v29  ;;  %v3471_v32 = vpop.f32.mrb[17].mxu0  ;;  %v45_v29 = vld [vmem:[%s4370_s10 + $0x6] ss:$0 sm:$0xff] }
 0x5be   :  { %v2307_v33 = vmax.f32 %v4229_v31, 0.0 }
 0x5c0   :  { %2841 = vmatmul.mubr.msk.f32.vlgmr.msra.gmra.mrb[18].mxu0 %vm2343_vm5, %v2307_v33 }
 0x5c1   :  { %3625 = vmatpush3.bf16.msra.mxu0 %v2921_v34 }
 0x5c2   :  { %3627 = vmatprep.subr.bf16.mxu0 %v3009_v35 }
 0x5c5   :  { %3629 = vmatpush3.bf16.msra.mxu0 %v3001_v36 }
 0x5c6   :  { %3631 = vmatprep.subr.bf16.mxu0 %v3010_v37 }
 0x5c9   :  { %3633 = vmatpush3.bf16.msra.mxu0 %v3002_v38 }
 0x5ca   :  { %3635 = vmatprep.subr.bf16.mxu0 %v3011_v39 }
 0x5cd   :  { %3637 = vmatpush3.bf16.msra.mxu0 %v3003_v40 }
 0x5ce   :  { %3639 = vmatprep.subr.bf16.mxu0 %v3012_v41 }
 0x5d1   :  { %3641 = vmatpush3.bf16.msra.mxu0 %v3004_v42 }
 0x5d2   :  { %3643 = vmatprep.subr.bf16.mxu0 %v3013_v43 }
 0x5d5   :  { %3645 = vmatpush3.bf16.msra.mxu0 %v3005_v44 }
 0x5d6   :  { %3647 = vmatprep.subr.bf16.mxu0 %v3014_v45 }
 0x5d9   :  { %3649 = vmatpush3.bf16.msra.mxu0 %v3006_v46 }
 0x5da   :  { %3651 = vmatprep.subr.bf16.mxu0 %v3015_v47 }
 0x5dd   :  { %3653 = vmatpush3.bf16.msra.mxu0 %v3007_v48 }
 0x5de   :  { %3654 = vmatprep.subr.bf16.mxu0 %v3764_v0 }
 0x693   :  { %v2413_v56 = vpop.f32.mrb[18].mxu0 }
 0x694   :  { %v2414_v57 = vadd.f32 %v2413_v56, %v2336_v54  ;;  %v2415_v58 = vpop.f32.mrb[19].mxu0 }
 0x695   :  { %v2416_v61 = vadd.f32 %v2415_v58, %v2340_v55 }
 0x696   :  { %v2418_v1 = vmax.f32 %v2414_v57, 0.0 }
 0x697   :  { %v2419_v62 = vmax.f32 %v2416_v61, 0.0 }
 0x699   :  { %2548 = vmatprep.mubr.f32.mxu0 %v2419_v62 }
 0x69a   :  { %2549 = vmatmul.mubr.f32.vlgmr.msra.gmra.mrb[20].mxu0 %v2418_v1 }
 0x69b   :  { %3656 = vmatpush3.bf16.msra.mxu0 %v3655_v63  ;;  %3488 = vmatprep.mubr.msk.f32.mxu0 %vm3765_vm0, %v3766_v3 }
 0x69c   :  { %3657 = vmatprep.subr.bf16.mxu0 %v3764_v0 }
 0x69f   :  { %3659 = vmatpush3.bf16.msra.mxu0 %v3658_v5 }
 0x6a0   :  { %3660 = vmatprep.subr.bf16.mxu0 %v3764_v0 }
 0x6a3   :  { %3662 = vmatpush3.bf16.msra.mxu0 %v3661_v8 }
 0x6a4   :  { %3663 = vmatprep.subr.bf16.mxu0 %v3764_v0 }
 0x6a7   :  { %3665 = vmatpush3.bf16.msra.mxu0 %v3664_v11 }
 0x6a8   :  { %3666 = vmatprep.subr.bf16.mxu0 %v3764_v0 }
 0x6aa   :  { %3489 = vmatmul.mubr.msk.f32.vlgmr.msra.gmra.mrb[22].mxu0 %vm2343_vm5, %v2307_v33 }
 0x6ab   :  { %3668 = vmatpush3.bf16.msra.mxu0 %v3667_v14  ;;  %3507 = vmatprep.mubr.msk.f32.mxu0 %vm3765_vm0, %v3766_v3  ;;  %v46_v3 = vld [vmem:[%s4370_s10 + $0x7] ss:$0 sm:$0xff] }
 0x6ac   :  { %3669 = vmatprep.subr.bf16.mxu0 %v3764_v0 }
 0x6af   :  { %3671 = vmatpush3.bf16.msra.mxu0 %v3670_v17 }
 0x6b0   :  { %3672 = vmatprep.subr.bf16.mxu0 %v3764_v0 }
 0x6b3   :  { %3674 = vmatpush3.bf16.msra.mxu0 %v3673_v20 }
 0x6b4   :  { %3675 = vmatprep.subr.bf16.mxu0 %v3764_v0  ;;  %v44_v0 = vld [vmem:[%s4370_s10 + $0x5] ss:$0 sm:$0xff] }
 0x6b7   :  { %3677 = vmatpush3.bf16.msra.mxu0 %v3676_v23 }
 0x76d   :  { %v3171_v24 = vpop.f32.mrb[20].mxu0 }
 0x76e   :  { %v3172_v25 = vpop.f32.mrb[21].mxu0 }
 0x76f   :  { %v3173_v26 = vadd.f32 %v3172_v25, %v3171_v24 }
 0x771   :  { %v2551_v27 = vadd.f32 %v3173_v26, %v44_v0 }
 0x773   :  { %v2554_v28 = vmax.f32 %v2551_v27, 0.0 }
 0x775   :  { %3508 = vmatmul.mubr.msk.f32.vlgmr.msra.gmra.mrb[24].mxu0 %vm2343_vm5, %v2554_v28 }
 0x77d   :  { %v2629_v30 = vpop.f32.mrb[22].mxu0 }
 0x77e   :  { %v2630_v31 = vadd.f32 %v2629_v30, %v45_v29  ;;  %v3490_v32 = vpop.f32.mrb[23].mxu0 }
 0x780   :  { %2716 = vst.msk [vmem:[%s4377_s11] sm:$0x1] %vm2715_vm6, %v2630_v31 }
 0x848   :  { %v2710_v33 = vpop.f32.mrb[24].mxu0 }
 0x849   :  { %v2711_v34 = vadd.f32 %v2710_v33, %v46_v3  ;;  %v3509_v35 = vpop.f32.mrb[25].mxu0 }
 0x84b   :  { %2718 = vst.msk [vmem:[%s4377_s11 + $0x1] sm:$0x1] %vm2717_vm7, %v2711_v34 }

</bundles_post_ra>
